<compile_context>
chip_gen: v7x
topology: tpu7x:2x2x1
jax: 0.10.0
libtpu: 0.0.40
codegen_flags: <defaults>
</compile_context>

<pallas_src>
import jax
import jax.numpy as jnp
from jax.experimental import pallas as pl
from jax.experimental.pallas import tpu as pltpu

BN_EPS = 1e-5


def _stats_kernel(x_ref, w_ref, sum_ref, sumsq_ref):
    """Phase 1: per-(sample, channel) sum and sum-of-squares of t = W @ x.

    No bias, no mask: the conv bias cancels inside BatchNorm (handled in the
    wrapper) and zero-padded columns contribute exactly 0 to both sums.
    """
    j = pl.program_id(1)

    @pl.when(j == 0)
    def _():
        sum_ref[...] = jnp.zeros_like(sum_ref)
        sumsq_ref[...] = jnp.zeros_like(sumsq_ref)

    x = x_ref[...].astype(jnp.bfloat16)                               # (Cin, THW)
    t = jnp.dot(w_ref[...], x, preferred_element_type=jnp.float32)    # (Cout, THW)
    sum_ref[...] += jnp.sum(t, axis=1, keepdims=True)
    sumsq_ref[...] += jnp.sum(t * t, axis=1, keepdims=True)


def _apply_kernel(x_ref, w_ref, scale_ref, shift_ref, o_ref):
    """Phase 2: y = W @ x, folded BN scale/shift in f32, then ReLU."""
    x = x_ref[...].astype(jnp.bfloat16)
    y = jnp.dot(w_ref[...], x, preferred_element_type=jnp.float32)
    z = y * scale_ref[...] + shift_ref[...]
    o_ref[...] = jnp.maximum(z, 0.0).astype(o_ref.dtype)


def _vmem_capacity_bytes():
    try:
        return int(pltpu.get_tpu_info().vmem_capacity_bytes)
    except Exception:
        return 64 * 1024 * 1024  # conservative fallback (v7x per-core VMEM)


def _choose_tile_hw(hw, cin, cout, out_bytes, tile_budget_bytes):
    """Largest lane tile (multiple of 128, or full H*W) such that the
    double-buffered DMA tiles plus in-kernel f32 intermediates fit the VMEM
    budget, overshooting H*W by at most ~128 lanes per tile."""
    bytes_per_col = (2 * cin * 4          # 2-deep f32 input tile buffers
                     + 2 * cout * out_bytes   # 2-deep output tile buffers
                     + cin * 2            # in-kernel bf16 input copy
                     + 3 * cout * 4)      # f32 dot result / t*t / z temporaries
    thw_max = max(128, (tile_budget_bytes // bytes_per_col) // 128 * 128)
    if hw <= thw_max:
        return hw, 1, hw                  # single full-extent tile, no padding
    num_tiles = pl.cdiv(hw, thw_max)
    thw = pl.cdiv(pl.cdiv(hw, num_tiles), 128) * 128
    return thw, num_tiles, num_tiles * thw


def conv_bn_relu(x_nchw, weight, bias, gamma, beta, out_dtype=jnp.float32):
    """x_nchw: (N, Cin, H, W); weight: (Cout, Cin) (1x1 conv); bias/gamma/beta: (Cout,)."""
    N, Cin, H, W = x_nchw.shape
    Cout = weight.shape[0]
    HW = H * W
    M = N * HW

    vmem_cap = _vmem_capacity_bytes()
    vmem_limit = int(min(vmem_cap * 3 // 4, 96 * 1024 * 1024))
    out_bytes = jnp.dtype(out_dtype).itemsize
    THW, num_tiles, hw_pad = _choose_tile_hw(HW, Cin, Cout, out_bytes, vmem_limit // 2)

    # Free reshape: NCHW -> (N, Cin, H*W).  No transpose, no cast, no copy.
    x = x_nchw.reshape(N, Cin, HW)
    if hw_pad != HW:
        # Only needed for ragged H*W that must be tiled; zero columns add 0 to stats.
        x = jnp.pad(x, ((0, 0), (0, 0), (0, hw_pad - HW)))

    w_bf = weight.astype(jnp.bfloat16)                     # (Cout, Cin), tiny
    b_col = bias.reshape(Cout, 1).astype(jnp.float32)
    g_col = gamma.reshape(Cout, 1).astype(jnp.float32)
    be_col = beta.reshape(Cout, 1).astype(jnp.float32)

    def cparams(sem):
        return pltpu.CompilerParams(dimension_semantics=sem,
                                    vmem_limit_bytes=vmem_limit)

    # ---- Phase 1: per-sample batch statistics of t = W @ x. ----
    # Grid (N, hw-tiles): N is "parallel" (per-sample partial sums -> both v7x
    # TensorCores), the hw-tile axis is the resident-accumulator reduction.
    sum_n, sumsq_n = pl.pallas_call(
        _stats_kernel,
        out_shape=(jax.ShapeDtypeStruct((N, Cout, 1), jnp.float32),
                   jax.ShapeDtypeStruct((N, Cout, 1), jnp.float32)),
        grid=(N, num_tiles),
        in_specs=[
            pl.BlockSpec((pl.Squeezed(), Cin, THW), lambda n, j: (n, 0, j)),
            pl.BlockSpec((Cout, Cin), lambda n, j: (0, 0)),
        ],
        out_specs=(pl.BlockSpec((pl.Squeezed(), Cout, 1), lambda n, j: (n, 0, 0)),
                   pl.BlockSpec((pl.Squeezed(), Cout, 1), lambda n, j: (n, 0, 0))),
        compiler_params=cparams(("parallel", "arbitrary")),
    )(x, w_bf)

    # Fold training-mode BN (biased variance) + conv bias into per-channel
    # scale/shift.  Tiny (Cout, 1) math in plain JAX between the two calls.
    # mean_y = mean_t + bias; var_y = var_t (variance is shift-invariant), so
    # the bias cancels in the normalized output.
    # Note: E[t^2]-E[t]^2 in f32 can cancel badly if |mean| >> std for some
    # channel; per-sample partials are combined here which mitigates it for
    # typical inputs.
    inv_m = 1.0 / float(M)
    mean_t = jnp.sum(sum_n, axis=0) * inv_m                        # (Cout, 1)
    var = jnp.maximum(jnp.sum(sumsq_n, axis=0) * inv_m - mean_t * mean_t, 0.0)
    mean_y = mean_t + b_col
    inv_std = jax.lax.rsqrt(var + BN_EPS)
    scale = g_col * inv_std                                        # (Cout, 1)
    shift = (b_col - mean_y) * scale + be_col                      # == beta - scale*mean_t
    # TODO(synk): BatchNorm2d running_mean/running_var buffer updates (training
    # side effects) are not materialized; this is the pure forward normalization.

    # ---- Phase 2: y = W @ x, scale/shift + ReLU.  Fully parallel tiles. ----
    out = pl.pallas_call(
        _apply_kernel,
        out_shape=jax.ShapeDtypeStruct((N, Cout, hw_pad), out_dtype),
        grid=(N, num_tiles),
        in_specs=[
            pl.BlockSpec((pl.Squeezed(), Cin, THW), lambda n, j: (n, 0, j)),
            pl.BlockSpec((Cout, Cin), lambda n, j: (0, 0)),
            pl.BlockSpec((Cout, 1), lambda n, j: (0, 0)),
            pl.BlockSpec((Cout, 1), lambda n, j: (0, 0)),
        ],
        out_specs=pl.BlockSpec((pl.Squeezed(), Cout, THW), lambda n, j: (n, 0, j)),
        compiler_params=cparams(("parallel", "parallel")),
    )(x, w_bf, scale, shift)

    if hw_pad != HW:
        out = out[:, :, :HW]
    return out.reshape(N, Cout, H, W)      # free reshape back to NCHW


def make_params(key, in_channels, out_channels):
    """Deterministic init matching ConvBnRelu defaults: kaiming_normal_ conv
    weight (fan_in, gain=sqrt(2)), zero conv bias, BN gamma=1, beta=0."""
    fan_in = in_channels * 1 * 1
    std = (2.0 / fan_in) ** 0.5
    weight = std * jax.random.normal(key, (out_channels, in_channels), dtype=jnp.float32)
    bias = jnp.zeros((out_channels,), dtype=jnp.float32)
    gamma = jnp.ones((out_channels,), dtype=jnp.float32)
    beta = jnp.zeros((out_channels,), dtype=jnp.float32)
    return weight, bias, gamma, beta


if __name__ == "__main__":
    key = jax.random.PRNGKey(0)
    k_x, k_w = jax.random.split(key)

    N, Cin, H, W = 2, 4, 16, 16
    Cout = 8

    x = jax.random.normal(k_x, (N, Cin, H, W), dtype=jnp.float32)
    weight, bias, gamma, beta = make_params(k_w, Cin, Cout)

    out = conv_bn_relu(x, weight, bias, gamma, beta)
    jax.block_until_ready(out)

    # Pure-JAX reference on the same bf16-quantized matmul operands the kernel
    # feeds to the MXU (products are exact in the f32 accumulator, so this is
    # an apples-to-apples comparison at f32 rounding level).
    x_q = x.astype(jnp.bfloat16).astype(jnp.float32)
    w_q = weight.astype(jnp.bfloat16).astype(jnp.float32)
    y_ref = jnp.einsum("nchw,oc->nohw", x_q, w_q) + bias[None, :, None, None]
    mean = jnp.mean(y_ref, axis=(0, 2, 3), keepdims=True)
    var = jnp.mean((y_ref - mean) ** 2, axis=(0, 2, 3), keepdims=True)
    y_bn = (y_ref - mean) * jax.lax.rsqrt(var + BN_EPS)
    y_bn = y_bn * gamma[None, :, None, None] + beta[None, :, None, None]
    ref = jnp.maximum(y_bn, 0.0)

    assert out.shape == (N, Cout, H, W)
    max_err = float(jnp.max(jnp.abs(out - ref)))
    assert jnp.allclose(out, ref, atol=1e-3, rtol=1e-3), f"max abs err {max_err}"

    print("KERNEL_OK")
</pallas_src>

<mosaic_0001>
module attributes {stable_mosaic.version = 11 : i64} {
  func.func @_stats_kernel(%arg0: i32, %arg1: i32, %arg2: memref<1x4x256xf32, #tpu.memory_space<vmem>>, %arg3: memref<8x4xbf16, #tpu.memory_space<vmem>>, %arg4: memref<1x8x1xf32, #tpu.memory_space<vmem>>, %arg5: memref<1x8x1xf32, #tpu.memory_space<vmem>>) attributes {dimension_semantics = [#tpu.dimension_semantics<parallel>, #tpu.dimension_semantics<arbitrary>], iteration_bounds = array<i64: 2, 1>, scalar_prefetch = 0 : i64, scratch_operands = 0 : i64, tpu.core_type = #tpu.core_type<tc>, window_params = [{transform_indices = @transform_0, window_bounds = array<i64: 1, 4, 256>}, {pipeline_mode = #tpu.pipeline_mode<synchronous>, transform_indices = @transform_1, window_bounds = array<i64: 8, 4>}, {transform_indices = @transform_2, window_bounds = array<i64: 1, 8, 1>}, {transform_indices = @transform_3, window_bounds = array<i64: 1, 8, 1>}]} {
    %c0_i32 = arith.constant 0 : i32
    %0 = arith.cmpi eq, %arg1, %c0_i32 : i32
    %1 = arith.extui %0 : i1 to i32
    %c0_i32_0 = arith.constant 0 : i32
    %2 = arith.cmpi ne, %1, %c0_i32_0 : i32
    scf.if %2 {
      %cst_19 = arith.constant 0.000000e+00 : f32
      %25 = vector.broadcast %cst_19 : f32 to vector<8x1xf32>
      %c0_20 = arith.constant 0 : index
      %c0_21 = arith.constant 0 : index
      %c0_22 = arith.constant 0 : index
      %26 = vector.load %arg4[%c0_20, %c0_21, %c0_22] : memref<1x8x1xf32, #tpu.memory_space<vmem>>, vector<1x8x1xf32>
      %27 = vector.shape_cast %26 : vector<1x8x1xf32> to vector<8x1xf32>
      %28 = vector.shape_cast %25 : vector<8x1xf32> to vector<1x8x1xf32>
      tpu.vector_store %arg4[%c0_20, %c0_21, %c0_22], %28 {strides = array<i32>} : memref<1x8x1xf32, #tpu.memory_space<vmem>>, vector<1x8x1xf32>,
      %cst_23 = arith.constant 0.000000e+00 : f32
      %29 = vector.broadcast %cst_23 : f32 to vector<8x1xf32>
      %c0_24 = arith.constant 0 : index
      %c0_25 = arith.constant 0 : index
      %c0_26 = arith.constant 0 : index
      %30 = vector.load %arg5[%c0_24, %c0_25, %c0_26] : memref<1x8x1xf32, #tpu.memory_space<vmem>>, vector<1x8x1xf32>
      %31 = vector.shape_cast %30 : vector<1x8x1xf32> to vector<8x1xf32>
      %32 = vector.shape_cast %29 : vector<8x1xf32> to vector<1x8x1xf32>
      tpu.vector_store %arg5[%c0_24, %c0_25, %c0_26], %32 {strides = array<i32>} : memref<1x8x1xf32, #tpu.memory_space<vmem>>, vector<1x8x1xf32>,
    } else {
    }
    %c0 = arith.constant 0 : index
    %c0_1 = arith.constant 0 : index
    %c0_2 = arith.constant 0 : index
    %3 = vector.load %arg2[%c0, %c0_1, %c0_2] : memref<1x4x256xf32, #tpu.memory_space<vmem>>, vector<1x4x256xf32>
    %4 = vector.shape_cast %3 : vector<1x4x256xf32> to vector<4x256xf32>
    %5 = arith.truncf %4 : vector<4x256xf32> to vector<4x256xbf16>
    %c0_3 = arith.constant 0 : index
    %c0_4 = arith.constant 0 : index
    %6 = vector.load %arg3[%c0_3, %c0_4] : memref<8x4xbf16, #tpu.memory_space<vmem>>, vector<8x4xbf16>
    %cst = arith.constant dense<0.000000e+00> : vector<8x256xf32>
    %7 = tpu.matmul %6, %5, %cst {dimension_numbers = #tpu.dot_dimension_numbers<[1], [0], [0], [1], [0, 0, 1, 1], [], []>} : vector<8x4xbf16>, vector<4x256xbf16>, vector<8x256xf32> -> vector<8x256xf32>
    %c0_5 = arith.constant 0 : index
    %c0_6 = arith.constant 0 : index
    %c0_7 = arith.constant 0 : index
    %8 = vector.load %arg4[%c0_5, %c0_6, %c0_7] : memref<1x8x1xf32, #tpu.memory_space<vmem>>, vector<1x8x1xf32>
    %9 = vector.shape_cast %8 : vector<1x8x1xf32> to vector<8x1xf32>
    %cst_8 = arith.constant dense<0.000000e+00> : vector<8xf32>
    %10 = vector.multi_reduction <add>, %7, %cst_8 [1] : vector<8x256xf32> to vector<8xf32>
    %11 = vector.shape_cast %10 : vector<8xf32> to vector<8x1xf32>
    %12 = arith.addf %9, %11 : vector<8x1xf32>
    %c0_9 = arith.constant 0 : index
    %c0_10 = arith.constant 0 : index
    %c0_11 = arith.constant 0 : index
    %13 = vector.load %arg4[%c0_9, %c0_10, %c0_11] : memref<1x8x1xf32, #tpu.memory_space<vmem>>, vector<1x8x1xf32>
    %14 = vector.shape_cast %13 : vector<1x8x1xf32> to vector<8x1xf32>
    %15 = vector.shape_cast %12 : vector<8x1xf32> to vector<1x8x1xf32>
    tpu.vector_store %arg4[%c0_9, %c0_10, %c0_11], %15 {strides = array<i32>} : memref<1x8x1xf32, #tpu.memory_space<vmem>>, vector<1x8x1xf32>,
    %c0_12 = arith.constant 0 : index
    %c0_13 = arith.constant 0 : index
    %c0_14 = arith.constant 0 : index
    %16 = vector.load %arg5[%c0_12, %c0_13, %c0_14] : memref<1x8x1xf32, #tpu.memory_space<vmem>>, vector<1x8x1xf32>
    %17 = vector.shape_cast %16 : vector<1x8x1xf32> to vector<8x1xf32>
    %18 = arith.mulf %7, %7 : vector<8x256xf32>
    %cst_15 = arith.constant dense<0.000000e+00> : vector<8xf32>
    %19 = vector.multi_reduction <add>, %18, %cst_15 [1] : vector<8x256xf32> to vector<8xf32>
    %20 = vector.shape_cast %19 : vector<8xf32> to vector<8x1xf32>
    %21 = arith.addf %17, %20 : vector<8x1xf32>
    %c0_16 = arith.constant 0 : index
    %c0_17 = arith.constant 0 : index
    %c0_18 = arith.constant 0 : index
    %22 = vector.load %arg5[%c0_16, %c0_17, %c0_18] : memref<1x8x1xf32, #tpu.memory_space<vmem>>, vector<1x8x1xf32>
    %23 = vector.shape_cast %22 : vector<1x8x1xf32> to vector<8x1xf32>
    %24 = vector.shape_cast %21 : vector<8x1xf32> to vector<1x8x1xf32>
    tpu.vector_store %arg5[%c0_16, %c0_17, %c0_18], %24 {strides = array<i32>} : memref<1x8x1xf32, #tpu.memory_space<vmem>>, vector<1x8x1xf32>,
    return
  }
  func.func @transform_0(%arg0: i32, %arg1: i32) -> (i32, i32, i32) {
    %c0_i32 = arith.constant 0 : i32
    %c0_i32_0 = arith.constant 0 : i32
    return %arg0, %c0_i32, %arg1 : i32, i32, i32
  }
  func.func @transform_1(%arg0: i32, %arg1: i32) -> (i32, i32) {
    %c0_i32 = arith.constant 0 : i32
    %c0_i32_0 = arith.constant 0 : i32
    %c0_i32_1 = arith.constant 0 : i32
    return %c0_i32, %c0_i32_0 : i32, i32
  }
  func.func @transform_2(%arg0: i32, %arg1: i32) -> (i32, i32, i32) {
    %c0_i32 = arith.constant 0 : i32
    %c0_i32_0 = arith.constant 0 : i32
    %c0_i32_1 = arith.constant 0 : i32
    return %arg0, %c0_i32, %c0_i32_0 : i32, i32, i32
  }
  func.func @transform_3(%arg0: i32, %arg1: i32) -> (i32, i32, i32) {
    %c0_i32 = arith.constant 0 : i32
    %c0_i32_0 = arith.constant 0 : i32
    %c0_i32_1 = arith.constant 0 : i32
    return %arg0, %c0_i32, %c0_i32_0 : i32, i32, i32
  }
}

</mosaic_0001>

<bundles_post_ra>
// kernel: tpu_custom_call.1
= control target key start
LH: loop header
LB: loop body
LE: loop exit
PB: predicated region body
PF: predicated region fallthrough
CT: control target
= control target key end

     0   :  { %9 = vsyncpa [#allocation3], 0  ;;  %s718_s0 = inlined_call_operand.hbm [shape: f32[2,4,256], index: 0, kind: input, shape index: {}]   ;;  %s719_s1 = inlined_call_operand.vmem [shape: bf16[8,4], index: 1, kind: input, shape index: {}]   ;;  %s720_s2 = inlined_call_operand.vmem [shape: f32[2,8,1], index: 2, kind: output, shape index: {0}]   ;;  %s721_s3 = inlined_call_operand.vmem [shape: f32[2,8,1], index: 3, kind: output, shape index: {1}]  }
   0x1   :  { %11 = vsyncpa [#allocation3 + $0x1], 0  ;;  %s583_s12 = smov 0   ;;  %s585_s13 = smov 0  }
   0x2   :  { %s587_s14 = smov 0   ;;  %s589_s15 = smov 0  }
   0x3   :  { %s591_s16 = smov 0   ;;  %s593_s17 = smov 0  }
   0x4 LB: > { %s404_s18 = sadd.s32 4294967295, %s558_s17   ;;  %s29_s19 = sadd.s32 1, %s554_s16  ;;  %s558_s17 = sphi %s593_s17, %s17_s17   ;;  %s554_s16 = sphi %s591_s16, %s731_s16   ;;  %s550_s15 = sphi %s589_s15, %s730_s15   ;;  %s546_s14 = sphi %s587_s14, %s729_s14   ;;  %s542_s13 = sphi %s585_s13, %s728_s13   ;;  %s538_s12 = sphi %s583_s12, %s727_s12  }
   0x5   : > { %p31_p0 = scmp.ge.s32.totalorder %s29_s19, 2  ;;  %s38_s20 = sadd.s32 1, %s546_s14 }
   0x6   : > { %p45_p1 = scmp.ne.s32.totalorder %s546_s14, %s542_s13  ;;  %p46_p2 = scmp.eq.s32.totalorder %s558_s17, 0 }
   0x7   : > { %s733_s19 = smov (%p31_p0, %s29_s19), 0  ;;  %p51_p4 = scmp.ne.s32.totalorder %s542_s13, %s538_s12 }
   0x8   : > { %p619_p3 = por %p46_p2, %p45_p1  ;;  %s33_s22 = ssub.s32 %s554_s16, %s733_s19 }
   0x9   : > { %p52_p5 = scmp.eq.s32.totalorder %s404_s18, 0  ;;  %p36_p6 = scmp.eq.s32.totalorder %s33_s22, 0 }
   0xa   : > { %p426_p8 = scmp.lt.s32.totalorder %s558_s17, 2  ;;  %s151_s25 = sand.u32 1, %s546_s14  }
   0xb   : > { %p626_p7 = por %p52_p5, %p51_p4  ;;  %s419_s26 = sshll.u32 %s554_s16, 7 }
   0xc   : > { %s632_s24 = scalar_select %p36_p6, %s546_s14, %s38_s20  }
   0xd   : > { %s408_s27 = sshll.u32 %s151_s25, 3  ;;  %s639_s30 = scalar_lea.hbm %s718_s0, %s419_s26 }
   0xe   : > { %s155_s4 = scalar_lea.vmem [#allocation2], %s408_s27  ;;  %p643_p9 = pnand %p426_p8, %p619_p3 }
   0xf   : > { %s165_s5 = sshll.u32 %s155_s4, 4  ;;  %s152_s7 = scalar_lea.sflag [#allocation3], %s151_s25  ;;  %s647_s5 = int_to_ptr.vmem [resolvable:$true] %s165_s5 }
  0x10   : > { %s478_s8 = scalar_lea.hbm %s639_s30, 128  ;;  %p480_p13 = pneg %p643_p9 }
  0x11   : > { %p479_p12 = scmp.ne.s32.totalorder %s639_s30, %s478_s8  ;;  %s483_s11 = scalar_lea.hbm %s718_s0, 256 }
  0x12   : > { %p484_p2 = scmp.lt.u32.totalorder %s639_s30, %s718_s0  ;;  %p485_p3 = scmp.lt.u32.totalorder %s483_s11, %s478_s8 }
  0x13   : > { %p481_p0 = pnand %p480_p13, %p479_p12  ;;  %p487_p5 = scmp.lt.u32.totalorder %s478_s8, %s639_s30 }
  0x14   : > { %p486_p4 = por %p485_p3, %p484_p2 }
  0x15   : > { %p482_p1 = pneg %p481_p0 }
  0x16   : > { %p488_p6 = por %p487_p5, %p486_p4 }
  0x18   : > { %p489_p8 = pnand %p488_p6, %p482_p1 }
  0x1a   : > { %492 = shalt.err (!%p489_p8)
}
  0x1b   : > { %s493_s20 = scalar_lea.vmem %s647_s5, 128  ;;  %s560_s21 = smov [#allocation2]  }
  0x1c   : > { %p494_p12 = scmp.ne.s32.totalorder %s647_s5, %s493_s20  ;;  %s498_s22 = sshll.u32 %s560_s21, 4  ;;  %s499_s22 = int_to_ptr.vmem [resolvable:$false] %s498_s22 }
  0x1d   : > { %s500_s25 = scalar_lea.vmem %s499_s22, 256  ;;  %p501_p11 = scmp.lt.s32.totalorder %s647_s5, %s499_s22 }
  0x1e   : > { %p496_p0 = pnand %p494_p12, %p480_p13  ;;  %p502_p2 = scmp.lt.s32.totalorder %s500_s25, %s493_s20 }
  0x20   : > { %p497_p10 = pneg %p496_p0  ;;  %p503_p3 = por %p502_p2, %p501_p11 }
  0x22   : > { %p504_p4 = pnand %p503_p3, %p497_p10 }
  0x24   : > { %507 = shalt.err (!%p504_p4)
}
  0x25   : > { %425 = dma.hbm_to_vmem [thread:$0]  (!%p643_p9), %s639_s30, 128, %s647_s5, %s152_s7  }
  0x26   : > { %p725_p1 = scmp.lt.s32.totalorder %s558_s17, 3  ;;  %p726_p5 = scmp.ge.s32.totalorder %s558_s17, 1 }
  0x28   : > { %p171_p13 = pnand %p726_p5, %p725_p1 }
  0x29   : > { %s176_s26 = sand.u32 (!%p171_p13), 1, %s542_s13  }
  0x2a   : > { %174 = sbr.rel (%p171_p13) target bundleno = 423 (0x1a7), region = 28  ;;  %s412_s27 = sshll.u32 (!%p171_p13), %s176_s26, 3 }
  0x2b   : > { %s177_s28 = scalar_lea.sflag (!%p171_p13), [#allocation3], %s176_s26  ;;  %s180_s29 = scalar_lea.vmem (!%p171_p13), [#allocation2], %s412_s27 }
  0x31   : > { %533 = dma.done.wait (%p626_p7), %s177_s28, 128  }
  0x32   : > { %535 = vsyncadd (%p626_p7), %s177_s28, 4294967168  ;;  %v561_v0 = vmov 0   ;;  %v223_v1 = vld [vmem:[%s180_s29] sm:$0xff]  ;;  %vm234_vm0 = vcmask 1041408   ;;  %vm230_vm1 = vcmask 31744   ;;  %p207_p9 = scmp.lt.s32.totalorder %s550_s15, 1 }
  0x33   : > { %273 = vmatprep.mubr.bf16.mxu0 %v561_v0  ;;  %v225_v2 = vcombine.high %v223_v1, %v223_v1  ;;  %v227_v3 = vpack.c.bf16 %v223_v1, %v223_v1  ;;  %v229_v6 = vld [vmem:[%s719_s1] sm:$0xf]  ;;  %vm220_vm2 = vcmask 7168   ;;  %v562_v7 = vmov 0.0  }
  0x34   : > { %s735_s15 = smov (!%p207_p9, %s550_s15), 1 }
  0x35   : > { %v228_v4 = vpack.c.bf16 %v225_v2, %v225_v2  ;;  %v236_v5 = vsel %vm234_vm0, %v227_v3, 0  ;;  %s413_s23 = sshll.u32 %s735_s15, 3 }
  0x36   : > { %s210_s7 = scalar_lea.vmem %s720_s2, %s413_s23  ;;  %s214_s15 = scalar_lea.vmem %s721_s3, %s413_s23 }
  0x37   : > { %415 = vmatprep.subr.msk.bf16.mxu0 %vm234_vm0, %v228_v4  ;;  %221 = vst.msk [vmem:[%s210_s7] sm:$0xff] %vm220_vm2, %v562_v7  ;;  %222 = vst.msk [vmem:[%s214_s15] sm:$0xff] %vm220_vm2, %v562_v7 }
  0x38   : > { %242 = vmatpush1.bf16.msra.mxu0 %v236_v5 }
  0x3b   : > { %416 = vmatmul.mubr.msk.bf16.vlgmr.msra.gmra.mrb[0].mxu0 %vm230_vm1, %v229_v6 }
  0x3e   : > { %v282_v16 = vld [vmem:[%s210_s7] sm:$0xff] }
  0x3f   : > { %v289_v19 = vld [vmem:[%s214_s15] sm:$0xff] }
 0x10e   : > { %v275_v8 = vpop.f32.mrb[0].mxu0 }
 0x10f   : > { %v290_v9 = vmul.f32 %v275_v8, %v275_v8  ;;  %v277_v10 = vpop.f32.mrb[1].mxu0 }
 0x110   : > { %v291_v11 = vmul.f32 %v277_v10, %v277_v10  ;;  %v279_v12 = vpop.f32.mrb[2].mxu0  ;;  %v283_v13 = vadd.f32 %v277_v10, %v275_v8 }
 0x111   : > { %v280_v14 = vpop.f32.mrb[3].mxu0 }
 0x112   : > { %284 = vadd.xlane.f32.xlu0 %v283_v13  ;;  %v292_v15 = vadd.f32 %v291_v11, %v290_v9 }
 0x116   : > { %293 = vadd.xlane.f32.xlu0 %v292_v15 }
 0x19f   : > { %v285_v17 = vpop.xlane.xlu0 %284 }
 0x1a0   : > { %v286_v18 = vadd.f32 %v285_v17, %v282_v16 }
 0x1a2   : > { %288 = vst.msk [vmem:[%s210_s7] sm:$0xff] %vm220_vm2, %v286_v18 }
 0x1a3   : > { %v294_v20 = vpop.xlane.xlu0 %293 }
 0x1a4   : > { %v295_v21 = vadd.f32 %v294_v20, %v289_v19 }
 0x1a6   : > { %296 = vst.msk [vmem:[%s214_s15] sm:$0xff] %vm220_vm2, %v295_v21 }
 0x1a7 PF: > { %s17_s17 = sadd.s32 1, %s558_s17   ;;  %s727_s12 = smov %s542_s13 }
 0x1a8   : > { %p14_p7 = scmp.ge.s32.totalorder %s17_s17, 4   ;;  %s728_s13 = smov %s546_s14 }
 0x1a9   : > { %s729_s14 = smov %s632_s24  ;;  %s730_s15 = smov %s554_s16 }
 0x1aa   : > { %s731_s16 = smov %s733_s19  ;;  %16 = sbr.rel (!%p14_p7) target bundleno = 4 (0x4), region = 84 }
 0x1b1   :  { %330 = vsyncpa [#allocation3], 1 }
 0x1b2   :  { %332 = vsyncpa [#allocation3 + $0x1], 1 }

</bundles_post_ra>
